<compile_context>
chip_gen: v6e
topology: v6e:2x2x1
jax: 0.10.0
libtpu: 0.0.40
codegen_flags: <defaults>
</compile_context>

<pallas_src>
import jax
import jax.numpy as jnp
from jax.experimental import pallas as pl
from jax.experimental.pallas import tpu as pltpu


def _round_up(x, m):
    return (x + m - 1) // m * m


def _embed_matmul_kernel(s_ref, w_ref, a1_ref, o_ref):
    # s_ref: (tile_m, 4*pack) basis, w_ref: (4*pack, E*pack) block-diag table,
    # a1_ref: (1, E*pack) constant row.  One MXU matmul + broadcast add.
    acc = jnp.dot(s_ref[...], w_ref[...], preferred_element_type=jnp.float32)
    o_ref[...] = (acc + a1_ref[...]).astype(o_ref.dtype)


def _build_glue(traj_loc, mat2, vec, traj_len, loc_max):
    """Plain-JAX glue reproducing the python loop in Embed.forward."""
    B, N = vec.shape
    delta_t = jnp.broadcast_to(vec[:, :, None], (B, N, loc_max)).astype(jnp.float32)
    valid = jnp.arange(N)[None, :] < traj_len[:, None]            # (B, N) bool
    # NOTE: PyTorch indexing would error on out-of-range traj_loc; we clamp
    # instead (only differs on bad inputs).
    idx = jnp.clip(traj_loc - 1, 0, mat2.shape[0] - 1)
    gathered = mat2[idx]                                          # (B, N, loc_max)
    delta_s = jnp.where(valid[:, :, None], gathered, 0.0).astype(jnp.float32)
    mask_f = jnp.broadcast_to(valid[:, :, None], (B, N, loc_max)).astype(jnp.float32)
    return delta_s, delta_t, mask_f


def _build_basis(traj_loc, mat2, vec, traj_len, loc_max):
    """Per-row basis [ds, dt, m, dt*m] of shape (M, 4); ds*m == ds so not stored."""
    delta_s, delta_t, mask_f = _build_glue(traj_loc, mat2, vec, traj_len, loc_max)
    basis = jnp.stack([delta_s, delta_t, mask_f, delta_t * mask_f], axis=-1)
    return basis.reshape(-1, 4)


def _build_tables(weights, ex):
    """A4 (4, E) and a_1 (E,) such that  out = basis4 @ A4 + a_1  == forward."""
    su, sl, tu, tl = [float(v) for v in ex]
    inv_s = 1.0 / (su - sl)
    inv_t = 1.0 / (tu - tl)
    w_sl, w_su, w_tl, w_tu = [w.astype(jnp.float32) for w in weights]
    d_sl, d_su = w_sl[1] - w_sl[0], w_su[1] - w_su[0]
    d_tl, d_tu = w_tl[1] - w_tl[0], w_tu[1] - w_tu[0]
    a_1 = (su * w_sl[0] - sl * w_su[0]) * inv_s + (tu * w_tl[0] - tl * w_tu[0]) * inv_t
    a_s = inv_s * (w_su[0] - w_sl[0])
    a_t = inv_t * (w_tu[0] - w_tl[0])
    a_m = (su * d_sl - sl * d_su) * inv_s + (tu * d_tl - tl * d_tu) * inv_t
    a_sm = inv_s * (d_su - d_sl)
    a_tm = inv_t * (d_tu - d_tl)
    # ds*m == ds, so the ds*m table folds into the ds table.
    A4 = jnp.stack([a_s + a_sm, a_t, a_m, a_tm], axis=0)          # (4, E)
    return A4, a_1


def embed_forward(traj_loc, mat2, vec, traj_len, weights, ex, emb_size, loc_max,
                  *, tile_m_target=2048, out_dtype=jnp.float32):
    B, N = vec.shape
    M = B * N * loc_max
    E = int(emb_size)
    n_basis = 4
    pack = 128 // n_basis                      # 32 logical rows per kernel row
    K = n_basis * pack                         # 128 (lane-dense basis stream)
    Eout = E * pack                            # lane-dense output width

    # ---- glue: per-row basis (M, 4) + folded weight tables -----------------
    basis = _build_basis(traj_loc, mat2, vec, traj_len, loc_max)   # (M, 4) f32
    A4, a_1 = _build_tables(weights, ex)
    Wbd = jnp.kron(jnp.eye(pack, dtype=jnp.float32), A4)           # (K, Eout)
    a1_row = jnp.tile(a_1[None, :], (1, pack))                     # (1, Eout)

    # ---- pack 32 logical rows per 128-lane kernel row -----------------------
    M_pp = _round_up(M, pack)
    if M_pp != M:
        basis = jnp.pad(basis, ((0, M_pp - M), (0, 0)))
    rows = M_pp // pack
    S = basis.reshape(rows, K)                                     # bitcast reshape

    # ---- tiling: big tiles, but keep >= 4 grid steps when work allows ------
    tile_m = max(8, min(int(tile_m_target), _round_up(pl.cdiv(rows, 4), 8)))
    rows_pad = _round_up(rows, tile_m)
    if rows_pad != rows:
        S = jnp.pad(S, ((0, rows_pad - rows), (0, 0)))

    out_bytes = jnp.dtype(out_dtype).itemsize
    cost = pl.CostEstimate(
        flops=2 * rows_pad * K * Eout,
        transcendentals=0,
        bytes_accessed=(rows_pad * K * 4 + K * Eout * 4 + Eout * 4
                        + rows_pad * Eout * out_bytes))

    out_packed = pl.pallas_call(
        _embed_matmul_kernel,
        out_shape=jax.ShapeDtypeStruct((rows_pad, Eout), out_dtype),
        grid_spec=pltpu.PrefetchScalarGridSpec(
            num_scalar_prefetch=0,
            grid=(rows_pad // tile_m,),
            in_specs=[
                pl.BlockSpec((tile_m, K), lambda i: (i, 0)),       # basis stream
                pl.BlockSpec((K, Eout), lambda i: (0, 0)),         # resident table
                pl.BlockSpec((1, Eout), lambda i: (0, 0)),         # constant row
            ],
            out_specs=pl.BlockSpec((tile_m, Eout), lambda i: (i, 0)),
        ),
        compiler_params=pltpu.CompilerParams(
            dimension_semantics=("parallel",),
            vmem_limit_bytes=48 * 1024 * 1024),
        cost_estimate=cost,
    )(S, Wbd, a1_row)

    # Slices below are no-ops (and the reshape a bitcast) unless padding was
    # actually required, so the common case has no extra copy pass.
    out = out_packed
    if rows_pad != rows:
        out = out[:rows]
    out = out.reshape(rows * pack, E)
    if M_pp != M:
        out = out[:M]
    return out.reshape(B, N, loc_max, E)


def embed_reference(traj_loc, mat2, vec, traj_len, weights, ex, emb_size, loc_max):
    """Pure-JAX reference mirroring the PyTorch forward."""
    su, sl, tu, tl = ex
    delta_s, delta_t, mask_f = _build_glue(traj_loc, mat2, vec, traj_len, loc_max)
    mask_i = mask_f.astype(jnp.int32)
    w_sl, w_su, w_tl, w_tu = weights
    esl, esu, etl, etu = w_sl[mask_i], w_su[mask_i], w_tl[mask_i], w_tu[mask_i]
    vsl = (delta_s - sl)[..., None]
    vsu = (su - delta_s)[..., None]
    vtl = (delta_t - tl)[..., None]
    vtu = (tu - delta_t)[..., None]
    space = (esl * vsu + esu * vsl) / (su - sl)
    time_ = (etl * vtu + etu * vtl) / (tu - tl)
    return space + time_


if __name__ == "__main__":
    # Small synthetic shapes consistent with the module's forward.
    B, N = 2, 8          # batch, max trajectory length
    loc_max = 16         # number of candidate locations
    emb_size = 32        # embedding dim
    num_locs = 10        # rows of mat2 / location vocabulary

    # ex = (su, sl, tu, tl): spatial / temporal upper & lower bounds.
    ex = (100.0, 0.0, 50.0, 0.0)

    key = jax.random.PRNGKey(0)
    k1, k2, k3, k4, k5, k6, k7 = jax.random.split(key, 7)

    # Deterministic "nn.Embedding(2, emb_size)" weights for sl/su/tl/tu.
    w_sl = jax.random.normal(k1, (2, emb_size), dtype=jnp.float32)
    w_su = jax.random.normal(k2, (2, emb_size), dtype=jnp.float32)
    w_tl = jax.random.normal(k3, (2, emb_size), dtype=jnp.float32)
    w_tu = jax.random.normal(k4, (2, emb_size), dtype=jnp.float32)
    weights = (w_sl, w_su, w_tl, w_tu)

    # Inputs.
    traj_loc = jax.random.randint(k5, (B, N), 1, num_locs + 1, dtype=jnp.int32)
    mat2 = jax.random.uniform(k6, (num_locs, loc_max), dtype=jnp.float32) * ex[0]
    vec = jax.random.uniform(k7, (B, N), dtype=jnp.float32) * ex[2]
    traj_len = jnp.array([5, 8], dtype=jnp.int32)

    # TODO(synk): pass out_dtype=jnp.bfloat16 if downstream tolerates it (halves
    # the dominant output-writeback HBM traffic); kept f32 to match PyTorch.
    out = embed_forward(traj_loc, mat2, vec, traj_len, weights, ex, emb_size, loc_max)
    out = jax.block_until_ready(out)

    ref = embed_reference(traj_loc, mat2, vec, traj_len, weights, ex, emb_size, loc_max)
    assert out.shape == (B, N, loc_max, emb_size)
    assert jnp.allclose(out, ref, atol=1e-3, rtol=1e-3), "mismatch vs reference"

    print("KERNEL_OK")
</pallas_src>

<mosaic_0001>
module attributes {stable_mosaic.version = 11 : i64} {
  func.func @_embed_matmul_kernel(%arg0: i32, %arg1: memref<8x128xf32, #tpu.memory_space<vmem>>, %arg2: memref<128x1024xf32, #tpu.memory_space<vmem>>, %arg3: memref<1x1024xf32, #tpu.memory_space<vmem>>, %arg4: memref<8x1024xf32, #tpu.memory_space<vmem>>) attributes {dimension_semantics = [#tpu.dimension_semantics<parallel>], iteration_bounds = array<i64: 1>, scalar_prefetch = 0 : i64, scratch_operands = 0 : i64, tpu.core_type = #tpu.core_type<tc>, window_params = [{transform_indices = @transform_0, window_bounds = array<i64: 8, 128>}, {pipeline_mode = #tpu.pipeline_mode<synchronous>, transform_indices = @transform_1, window_bounds = array<i64: 128, 1024>}, {pipeline_mode = #tpu.pipeline_mode<synchronous>, transform_indices = @transform_2, window_bounds = array<i64: 1, 1024>}, {transform_indices = @transform_3, window_bounds = array<i64: 8, 1024>}]} {
    %c0 = arith.constant 0 : index
    %c0_0 = arith.constant 0 : index
    %0 = vector.load %arg1[%c0, %c0_0] : memref<8x128xf32, #tpu.memory_space<vmem>>, vector<8x128xf32>
    %c0_1 = arith.constant 0 : index
    %c0_2 = arith.constant 0 : index
    %1 = vector.load %arg2[%c0_1, %c0_2] : memref<128x1024xf32, #tpu.memory_space<vmem>>, vector<128x1024xf32>
    %cst = arith.constant dense<0.000000e+00> : vector<8x1024xf32>
    %2 = tpu.matmul %0, %1, %cst {dimension_numbers = #tpu.dot_dimension_numbers<[1], [0], [0], [1], [0, 0, 1, 1], [], []>} : vector<8x128xf32>, vector<128x1024xf32>, vector<8x1024xf32> -> vector<8x1024xf32>
    %c0_3 = arith.constant 0 : index
    %c0_4 = arith.constant 0 : index
    %3 = vector.load %arg3[%c0_3, %c0_4] : memref<1x1024xf32, #tpu.memory_space<vmem>>, vector<1x1024xf32>
    %4 = vector.broadcast %3 : vector<1x1024xf32> to vector<8x1024xf32>
    %5 = arith.addf %2, %4 : vector<8x1024xf32>
    %c0_5 = arith.constant 0 : index
    %c0_6 = arith.constant 0 : index
    %6 = vector.load %arg4[%c0_5, %c0_6] : memref<8x1024xf32, #tpu.memory_space<vmem>>, vector<8x1024xf32>
    tpu.vector_store %arg4[%c0_5, %c0_6], %5 {strides = array<i32>} : memref<8x1024xf32, #tpu.memory_space<vmem>>, vector<8x1024xf32>,
    return
  }
  func.func @transform_0(%arg0: i32) -> (i32, i32) {
    %c0_i32 = arith.constant 0 : i32
    %c0_i32_0 = arith.constant 0 : i32
    return %arg0, %c0_i32 : i32, i32
  }
  func.func @transform_1(%arg0: i32) -> (i32, i32) {
    %c0_i32 = arith.constant 0 : i32
    %c0_i32_0 = arith.constant 0 : i32
    %c0_i32_1 = arith.constant 0 : i32
    return %c0_i32, %c0_i32_0 : i32, i32
  }
  func.func @transform_2(%arg0: i32) -> (i32, i32) {
    %c0_i32 = arith.constant 0 : i32
    %c0_i32_0 = arith.constant 0 : i32
    %c0_i32_1 = arith.constant 0 : i32
    return %c0_i32, %c0_i32_0 : i32, i32
  }
  func.func @transform_3(%arg0: i32) -> (i32, i32) {
    %c0_i32 = arith.constant 0 : i32
    %c0_i32_0 = arith.constant 0 : i32
    return %arg0, %c0_i32 : i32, i32
  }
}

</mosaic_0001>

<bundles_post_ra>
// kernel: tpu_custom_call.1
= control target key start
LH: loop header
LB: loop body
LE: loop exit
PB: predicated region body
PF: predicated region fallthrough
CT: control target
= control target key end

     0   :  { %8 = vsyncpa [#allocation3], 0  ;;  %s673_s0 = inlined_call_operand.hbm [shape: f32[8,128], index: 0, kind: input, shape index: {}]   ;;  %s674_s1 = inlined_call_operand.hbm [shape: f32[128,1024], index: 1, kind: input, shape index: {}]   ;;  %s675_s2 = inlined_call_operand.hbm [shape: f32[1,1024], index: 2, kind: input, shape index: {}]   ;;  %s676_s3 = inlined_call_operand.hbm [shape: f32[8,1024], index: 3, kind: output, shape index: {}]  }
   0x1   :  { %9 = vsyncpa [#allocation6], 0 }
   0x2   :  { %10 = vsyncpa [#allocation4], 0  ;;  %s624_s12 = smov [#allocation5]  }
   0x3   :  { %s26_s13 = sshll.u32 %s624_s12, 4  ;;  %s27_s13 = int_to_ptr.vmem [resolvable:$true] %s26_s13 }
   0x4   :  { %s546_s14 = scalar_lea.vmem %s27_s13, 16384  ;;  %p551_p1 = scmp.lt.s32.totalorder %s27_s13, %s27_s13 }
   0x5   :  { %p547_p0 = scmp.ne.s32.totalorder %s27_s13, %s546_s14  ;;  %p552_p2 = scmp.lt.s32.totalorder %s546_s14, %s546_s14 }
   0x7   :  { %p553_p3 = por %p552_p2, %p551_p1 }
   0x9   :  { %p554_p4 = pnand %p553_p3, %p547_p0 }
   0xb   :  { %557 = shalt.err (!%p554_p4)
}
   0xc   :  { %s625_s15 = smov 1024   ;;  %s626_s16 = smov 64  }
   0xd   :  { %32 = dma.hbm_to_vmem [thread:$0]  %s674_s1, 16384, %s27_s13, [#allocation6], %s625_s15, %s625_s15, %s626_s16  }
   0xe   :  { %s627_s19 = smov [#allocation2]   ;;  %s628_s21 = smov [#allocation7]  }
   0xf   :  { %s17_s20 = sshll.u32 %s627_s19, 4  ;;  %s39_s22 = sshll.u32 %s628_s21, 4  ;;  %s18_s20 = int_to_ptr.vmem [resolvable:$true] %s17_s20  ;;  %s40_s22 = int_to_ptr.vmem [resolvable:$true] %s39_s22 }
  0x10   :  { %s566_s23 = scalar_lea.vmem %s18_s20, 128  ;;  %p571_p6 = scmp.lt.s32.totalorder %s18_s20, %s18_s20 }
  0x11   :  { %p567_p5 = scmp.ne.s32.totalorder %s18_s20, %s566_s23  ;;  %p572_p7 = scmp.lt.s32.totalorder %s566_s23, %s566_s23 }
  0x13   :  { %p573_p8 = por %p572_p7, %p571_p6 }
  0x15   :  { %p574_p9 = pnand %p573_p8, %p567_p5 }
  0x17   :  { %577 = shalt.err (!%p574_p9)
}
  0x18   :  { %20 = dma.hbm_to_vmem [thread:$0]  %s673_s0, 128, %s18_s20, [#allocation3]  }
  0x19   :  { %s586_s26 = scalar_lea.vmem %s40_s22, 128  ;;  %p591_p11 = scmp.lt.s32.totalorder %s40_s22, %s40_s22 }
  0x1a   :  { %p587_p10 = scmp.ne.s32.totalorder %s40_s22, %s586_s26  ;;  %p592_p12 = scmp.lt.s32.totalorder %s586_s26, %s586_s26 }
  0x1c   :  { %p593_p13 = por %p592_p12, %p591_p11 }
  0x1e   :  { %p594_p0 = pnand %p593_p13, %p587_p10 }
  0x20   :  { %597 = shalt.err (!%p594_p0)
}
  0x21   :  { %42 = dma.hbm_to_vmem [thread:$0]  %s675_s2, 128, %s40_s22, [#allocation6]  }
  0x22   :  { %618 = dma.done.wait [#allocation3], 128  }
  0x23   :  { %619 = vsyncadd [#allocation3], 4294967168 }
  0x24   :  { %620 = dma.done.wait [#allocation6], 16512  }
  0x25   :  { %621 = vsyncadd [#allocation6], 4294950784  ;;  %v629_v0 = vmov 0.0   ;;  %v174_v1 = vld [vmem:[#allocation5 + $0x3c8] sm:$0xff]  ;;  %v176_v2 = vld [vmem:[#allocation5 + $0x3d8] sm:$0xff]  ;;  %s630_s0 = smov [#allocation8]  }
  0x26   :  { %287 = vmatprep.mubr.f32.mxu0 %v629_v0  ;;  %358 = vmatprep.mubr.f32.mxu1 %v629_v0  ;;  %v173_v3 = vld [vmem:[#allocation5 + $0x3c0] sm:$0xff]  ;;  %v175_v4 = vld [vmem:[#allocation5 + $0x3d0] sm:$0xff]  ;;  %v166_v5 = vld [vmem:[#allocation5 + $0x388] sm:$0xff]  ;;  %s521_s2 = sshll.u32 %s630_s0, 4  ;;  %s522_s2 = int_to_ptr.vmem [resolvable:$true] %s521_s2 }
  0x27   :  { %223 = vmatprep.subr.mxu0 %v174_v1  ;;  %294 = vmatprep.subr.mxu1 %v176_v2  ;;  %v168_v6 = vld [vmem:[#allocation5 + $0x398] sm:$0xff]  ;;  %v165_v7 = vld [vmem:[#allocation5 + $0x380] sm:$0xff]  ;;  %v167_v8 = vld [vmem:[#allocation5 + $0x390] sm:$0xff]  ;;  %s598_s28 = scalar_lea.vmem %s522_s2, 1024  ;;  %p603_p2 = scmp.lt.s32.totalorder %s522_s2, %s522_s2 }
  0x28   :  { %224 = vmatpush1.msra.mxu0 %v173_v3  ;;  %295 = vmatpush1.msra.mxu1 %v175_v4  ;;  %v158_v9 = vld [vmem:[#allocation5 + $0x348] sm:$0xff]  ;;  %v160_v10 = vld [vmem:[#allocation5 + $0x358] sm:$0xff]  ;;  %v157_v11 = vld [vmem:[#allocation5 + $0x340] sm:$0xff]  ;;  %p599_p1 = scmp.ne.s32.totalorder %s522_s2, %s598_s28  ;;  %p604_p3 = scmp.lt.s32.totalorder %s598_s28, %s598_s28 }
  0x29   :  { %225 = vmatprep.subr.mxu0 %v166_v5  ;;  %296 = vmatprep.subr.mxu1 %v168_v6  ;;  %v159_v12 = vld [vmem:[#allocation5 + $0x350] sm:$0xff]  ;;  %v150_v13 = vld [vmem:[#allocation5 + $0x308] sm:$0xff]  ;;  %v152_v14 = vld [vmem:[#allocation5 + $0x318] sm:$0xff] }
  0x2a   :  { %226 = vmatpush1.msra.mxu0 %v165_v7  ;;  %297 = vmatpush1.msra.mxu1 %v167_v8  ;;  %v149_v15 = vld [vmem:[#allocation5 + $0x300] sm:$0xff]  ;;  %v151_v16 = vld [vmem:[#allocation5 + $0x310] sm:$0xff]  ;;  %v142_v17 = vld [vmem:[#allocation5 + $0x2c8] sm:$0xff]  ;;  %p605_p4 = por %p604_p3, %p603_p2 }
  0x2b   :  { %227 = vmatprep.subr.mxu0 %v158_v9  ;;  %298 = vmatprep.subr.mxu1 %v160_v10  ;;  %v144_v18 = vld [vmem:[#allocation5 + $0x2d8] sm:$0xff]  ;;  %v141_v19 = vld [vmem:[#allocation5 + $0x2c0] sm:$0xff]  ;;  %v143_v20 = vld [vmem:[#allocation5 + $0x2d0] sm:$0xff] }
  0x2c   :  { %228 = vmatpush1.msra.mxu0 %v157_v11  ;;  %299 = vmatpush1.msra.mxu1 %v159_v12  ;;  %v134_v21 = vld [vmem:[#allocation5 + $0x288] sm:$0xff]  ;;  %v136_v22 = vld [vmem:[#allocation5 + $0x298] sm:$0xff]  ;;  %v133_v23 = vld [vmem:[#allocation5 + $0x280] sm:$0xff]  ;;  %p606_p5 = pnand %p605_p4, %p599_p1 }
  0x2d   :  { %229 = vmatprep.subr.mxu0 %v150_v13  ;;  %300 = vmatprep.subr.mxu1 %v152_v14  ;;  %v135_v24 = vld [vmem:[#allocation5 + $0x290] sm:$0xff]  ;;  %v126_v25 = vld [vmem:[#allocation5 + $0x248] sm:$0xff]  ;;  %v128_v26 = vld [vmem:[#allocation5 + $0x258] sm:$0xff] }
  0x2e   :  { %230 = vmatpush1.msra.mxu0 %v149_v15  ;;  %301 = vmatpush1.msra.mxu1 %v151_v16  ;;  %v125_v27 = vld [vmem:[#allocation5 + $0x240] sm:$0xff]  ;;  %v127_v28 = vld [vmem:[#allocation5 + $0x250] sm:$0xff]  ;;  %v118_v29 = vld [vmem:[#allocation5 + $0x208] sm:$0xff] }
  0x2f   :  { %231 = vmatprep.subr.mxu0 %v142_v17  ;;  %302 = vmatprep.subr.mxu1 %v144_v18  ;;  %v120_v30 = vld [vmem:[#allocation5 + $0x218] sm:$0xff]  ;;  %v117_v31 = vld [vmem:[#allocation5 + $0x200] sm:$0xff]  ;;  %v119_v32 = vld [vmem:[#allocation5 + $0x210] sm:$0xff] }
  0x30   :  { %232 = vmatpush1.msra.mxu0 %v141_v19  ;;  %303 = vmatpush1.msra.mxu1 %v143_v20  ;;  %v110_v33 = vld [vmem:[#allocation5 + $0x1c8] sm:$0xff]  ;;  %v112_v34 = vld [vmem:[#allocation5 + $0x1d8] sm:$0xff]  ;;  %v109_v35 = vld [vmem:[#allocation5 + $0x1c0] sm:$0xff] }
  0x31   :  { %233 = vmatprep.subr.mxu0 %v134_v21  ;;  %304 = vmatprep.subr.mxu1 %v136_v22  ;;  %v111_v36 = vld [vmem:[#allocation5 + $0x1d0] sm:$0xff]  ;;  %v102_v37 = vld [vmem:[#allocation5 + $0x188] sm:$0xff]  ;;  %v104_v38 = vld [vmem:[#allocation5 + $0x198] sm:$0xff] }
  0x32   :  { %234 = vmatpush1.msra.mxu0 %v133_v23  ;;  %305 = vmatpush1.msra.mxu1 %v135_v24  ;;  %v101_v39 = vld [vmem:[#allocation5 + $0x180] sm:$0xff]  ;;  %v103_v40 = vld [vmem:[#allocation5 + $0x190] sm:$0xff]  ;;  %v94_v41 = vld [vmem:[#allocation5 + $0x148] sm:$0xff] }
  0x33   :  { %235 = vmatprep.subr.mxu0 %v126_v25  ;;  %306 = vmatprep.subr.mxu1 %v128_v26  ;;  %v96_v42 = vld [vmem:[#allocation5 + $0x158] sm:$0xff]  ;;  %v93_v43 = vld [vmem:[#allocation5 + $0x140] sm:$0xff]  ;;  %v95_v44 = vld [vmem:[#allocation5 + $0x150] sm:$0xff] }
  0x34   :  { %236 = vmatpush1.msra.mxu0 %v125_v27  ;;  %307 = vmatpush1.msra.mxu1 %v127_v28  ;;  %v86_v45 = vld [vmem:[#allocation5 + $0x108] sm:$0xff]  ;;  %v88_v46 = vld [vmem:[#allocation5 + $0x118] sm:$0xff]  ;;  %v85_v47 = vld [vmem:[#allocation5 + $0x100] sm:$0xff] }
  0x35   :  { %237 = vmatprep.subr.mxu0 %v118_v29  ;;  %308 = vmatprep.subr.mxu1 %v120_v30  ;;  %v87_v48 = vld [vmem:[#allocation5 + $0x110] sm:$0xff]  ;;  %v78_v49 = vld [vmem:[#allocation5 + $0xc8] sm:$0xff]  ;;  %v80_v50 = vld [vmem:[#allocation5 + $0xd8] sm:$0xff] }
  0x36   :  { %238 = vmatpush1.msra.mxu0 %v117_v31  ;;  %309 = vmatpush1.msra.mxu1 %v119_v32  ;;  %v77_v51 = vld [vmem:[#allocation5 + $0xc0] sm:$0xff]  ;;  %v79_v52 = vld [vmem:[#allocation5 + $0xd0] sm:$0xff]  ;;  %v70_v53 = vld [vmem:[#allocation5 + $0x88] sm:$0xff] }
  0x37   :  { %239 = vmatprep.subr.mxu0 %v110_v33  ;;  %310 = vmatprep.subr.mxu1 %v112_v34  ;;  %v72_v54 = vld [vmem:[#allocation5 + $0x98] sm:$0xff]  ;;  %v69_v55 = vld [vmem:[#allocation5 + $0x80] sm:$0xff]  ;;  %v71_v56 = vld [vmem:[#allocation5 + $0x90] sm:$0xff] }
  0x38   :  { %240 = vmatpush1.msra.mxu0 %v109_v35  ;;  %311 = vmatpush1.msra.mxu1 %v111_v36  ;;  %v62_v57 = vld [vmem:[#allocation5 + $0x48] sm:$0xff]  ;;  %v64_v58 = vld [vmem:[#allocation5 + $0x58] sm:$0xff]  ;;  %v61_v59 = vld [vmem:[#allocation5 + $0x40] sm:$0xff] }
  0x39   :  { %241 = vmatprep.subr.mxu0 %v102_v37  ;;  %312 = vmatprep.subr.mxu1 %v104_v38  ;;  %v63_v60 = vld [vmem:[#allocation5 + $0x50] sm:$0xff]  ;;  %v54_v61 = vld [vmem:[#allocation5 + $0x8] sm:$0xff]  ;;  %v56_v62 = vld [vmem:[#allocation5 + $0x18] sm:$0xff] }
  0x3a   :  { %242 = vmatpush1.msra.mxu0 %v101_v39  ;;  %313 = vmatpush1.msra.mxu1 %v103_v40  ;;  %v53_v63 = vld [vmem:[#allocation5] sm:$0xff]  ;;  %v55_v1 = vld [vmem:[#allocation5 + $0x10] sm:$0xff]  ;;  %v662_v2 = vld [vmem:[#allocation2] sm:$0xff] }
  0x3b   :  { %243 = vmatprep.subr.mxu0 %v94_v41  ;;  %314 = vmatprep.subr.mxu1 %v96_v42  ;;  %v178_v3 = vld [vmem:[#allocation5 + $0x3e8] sm:$0xff]  ;;  %v180_v4 = vld [vmem:[#allocation5 + $0x3f8] sm:$0xff]  ;;  %v177_v5 = vld [vmem:[#allocation5 + $0x3e0] sm:$0xff] }
  0x3c   :  { %244 = vmatpush1.msra.mxu0 %v93_v43  ;;  %315 = vmatpush1.msra.mxu1 %v95_v44  ;;  %v179_v6 = vld [vmem:[#allocation5 + $0x3f0] sm:$0xff]  ;;  %v170_v7 = vld [vmem:[#allocation5 + $0x3a8] sm:$0xff]  ;;  %v172_v8 = vld [vmem:[#allocation5 + $0x3b8] sm:$0xff] }
  0x3d   :  { %245 = vmatprep.subr.mxu0 %v86_v45  ;;  %316 = vmatprep.subr.mxu1 %v88_v46  ;;  %v169_v9 = vld [vmem:[#allocation5 + $0x3a0] sm:$0xff]  ;;  %v171_v10 = vld [vmem:[#allocation5 + $0x3b0] sm:$0xff]  ;;  %v162_v11 = vld [vmem:[#allocation5 + $0x368] sm:$0xff] }
  0x3e   :  { %246 = vmatpush1.msra.mxu0 %v85_v47  ;;  %317 = vmatpush1.msra.mxu1 %v87_v48  ;;  %v164_v12 = vld [vmem:[#allocation5 + $0x378] sm:$0xff]  ;;  %v161_v13 = vld [vmem:[#allocation5 + $0x360] sm:$0xff]  ;;  %v163_v14 = vld [vmem:[#allocation5 + $0x370] sm:$0xff] }
  0x3f   :  { %247 = vmatprep.subr.mxu0 %v78_v49  ;;  %318 = vmatprep.subr.mxu1 %v80_v50  ;;  %v154_v15 = vld [vmem:[#allocation5 + $0x328] sm:$0xff]  ;;  %v156_v16 = vld [vmem:[#allocation5 + $0x338] sm:$0xff]  ;;  %v153_v17 = vld [vmem:[#allocation5 + $0x320] sm:$0xff] }
  0x40   :  { %248 = vmatpush1.msra.mxu0 %v77_v51  ;;  %319 = vmatpush1.msra.mxu1 %v79_v52  ;;  %v155_v18 = vld [vmem:[#allocation5 + $0x330] sm:$0xff]  ;;  %v146_v19 = vld [vmem:[#allocation5 + $0x2e8] sm:$0xff]  ;;  %v148_v20 = vld [vmem:[#allocation5 + $0x2f8] sm:$0xff] }
  0x41   :  { %249 = vmatprep.subr.mxu0 %v70_v53  ;;  %320 = vmatprep.subr.mxu1 %v72_v54  ;;  %v145_v21 = vld [vmem:[#allocation5 + $0x2e0] sm:$0xff]  ;;  %v147_v22 = vld [vmem:[#allocation5 + $0x2f0] sm:$0xff]  ;;  %v138_v23 = vld [vmem:[#allocation5 + $0x2a8] sm:$0xff] }
  0x42   :  { %250 = vmatpush1.msra.mxu0 %v69_v55  ;;  %321 = vmatpush1.msra.mxu1 %v71_v56  ;;  %v140_v24 = vld [vmem:[#allocation5 + $0x2b8] sm:$0xff]  ;;  %v137_v25 = vld [vmem:[#allocation5 + $0x2a0] sm:$0xff]  ;;  %v139_v26 = vld [vmem:[#allocation5 + $0x2b0] sm:$0xff] }
  0x43   :  { %251 = vmatprep.subr.mxu0 %v62_v57  ;;  %322 = vmatprep.subr.mxu1 %v64_v58  ;;  %v130_v27 = vld [vmem:[#allocation5 + $0x268] sm:$0xff]  ;;  %v132_v28 = vld [vmem:[#allocation5 + $0x278] sm:$0xff]  ;;  %v129_v29 = vld [vmem:[#allocation5 + $0x260] sm:$0xff] }
  0x44   :  { %252 = vmatpush1.msra.mxu0 %v61_v59  ;;  %323 = vmatpush1.msra.mxu1 %v63_v60  ;;  %v131_v30 = vld [vmem:[#allocation5 + $0x270] sm:$0xff]  ;;  %v122_v31 = vld [vmem:[#allocation5 + $0x228] sm:$0xff]  ;;  %v124_v32 = vld [vmem:[#allocation5 + $0x238] sm:$0xff] }
  0x45   :  { %253 = vmatprep.subr.mxu0 %v54_v61  ;;  %324 = vmatprep.subr.mxu1 %v56_v62  ;;  %v121_v33 = vld [vmem:[#allocation5 + $0x220] sm:$0xff]  ;;  %v123_v34 = vld [vmem:[#allocation5 + $0x230] sm:$0xff]  ;;  %v114_v35 = vld [vmem:[#allocation5 + $0x1e8] sm:$0xff] }
  0x46   :  { %254 = vmatpush1.msra.mxu0 %v53_v63  ;;  %325 = vmatpush1.msra.mxu1 %v55_v1  ;;  %v116_v36 = vld [vmem:[#allocation5 + $0x1f8] sm:$0xff]  ;;  %v113_v37 = vld [vmem:[#allocation5 + $0x1e0] sm:$0xff]  ;;  %v115_v38 = vld [vmem:[#allocation5 + $0x1f0] sm:$0xff] }
  0x47   :  { %288 = vmatmul.mubr.f32.vlgmr.msra.gmra.mxu0 %v662_v2  ;;  %359 = vmatmul.mubr.f32.vlgmr.msra.gmra.mxu1 %v662_v2  ;;  %v106_v39 = vld [vmem:[#allocation5 + $0x1a8] sm:$0xff]  ;;  %v108_v40 = vld [vmem:[#allocation5 + $0x1b8] sm:$0xff]  ;;  %v105_v41 = vld [vmem:[#allocation5 + $0x1a0] sm:$0xff] }
  0x48   :  { %365 = vmatprep.subr.mxu0 %v178_v3  ;;  %436 = vmatprep.subr.mxu1 %v180_v4  ;;  %v107_v42 = vld [vmem:[#allocation5 + $0x1b0] sm:$0xff]  ;;  %v98_v43 = vld [vmem:[#allocation5 + $0x168] sm:$0xff]  ;;  %v100_v44 = vld [vmem:[#allocation5 + $0x178] sm:$0xff] }
  0x49   :  { %366 = vmatpush1.msra.mxu0 %v177_v5  ;;  %437 = vmatpush1.msra.mxu1 %v179_v6  ;;  %v97_v45 = vld [vmem:[#allocation5 + $0x160] sm:$0xff]  ;;  %v99_v46 = vld [vmem:[#allocation5 + $0x170] sm:$0xff]  ;;  %v90_v47 = vld [vmem:[#allocation5 + $0x128] sm:$0xff]  ;;  %v183_v5 = vlaneseq }
  0x4a   :  { %367 = vmatprep.subr.mxu0 %v170_v7  ;;  %438 = vmatprep.subr.mxu1 %v172_v8  ;;  %v92_v48 = vld [vmem:[#allocation5 + $0x138] sm:$0xff]  ;;  %v89_v49 = vld [vmem:[#allocation5 + $0x120] sm:$0xff]  ;;  %v91_v50 = vld [vmem:[#allocation5 + $0x130] sm:$0xff] }
  0x4b   :  { %368 = vmatpush1.msra.mxu0 %v169_v9  ;;  %439 = vmatpush1.msra.mxu1 %v171_v10  ;;  %v82_v51 = vld [vmem:[#allocation5 + $0xe8] sm:$0xff]  ;;  %v84_v52 = vld [vmem:[#allocation5 + $0xf8] sm:$0xff]  ;;  %v81_v53 = vld [vmem:[#allocation5 + $0xe0] sm:$0xff]  ;;  %v184_v6 = vshrl.u32 %v183_v5, 7 }
  0x4c   :  { %369 = vmatprep.subr.mxu0 %v162_v11  ;;  %440 = vmatprep.subr.mxu1 %v164_v12  ;;  %v83_v54 = vld [vmem:[#allocation5 + $0xf0] sm:$0xff]  ;;  %v74_v55 = vld [vmem:[#allocation5 + $0xa8] sm:$0xff]  ;;  %v76_v56 = vld [vmem:[#allocation5 + $0xb8] sm:$0xff] }
  0x4d   :  { %370 = vmatpush1.msra.mxu0 %v161_v13  ;;  %441 = vmatpush1.msra.mxu1 %v163_v14  ;;  %v73_v57 = vld [vmem:[#allocation5 + $0xa0] sm:$0xff]  ;;  %v75_v58 = vld [vmem:[#allocation5 + $0xb0] sm:$0xff]  ;;  %v66_v59 = vld [vmem:[#allocation5 + $0x68] sm:$0xff]  ;;  %v185_v7 = vsub.s32 0, %v184_v6  ;;  %v193_v8 = vsub.s32 2, %v184_v6  ;;  %v189_v10 = vsub.s32 1, %v184_v6 }
  0x4e   :  { %371 = vmatprep.subr.mxu0 %v154_v15  ;;  %442 = vmatprep.subr.mxu1 %v156_v16  ;;  %v68_v60 = vld [vmem:[#allocation5 + $0x78] sm:$0xff]  ;;  %v65_v61 = vld [vmem:[#allocation5 + $0x60] sm:$0xff]  ;;  %v67_v62 = vld [vmem:[#allocation5 + $0x70] sm:$0xff]  ;;  %v197_v11 = vsub.s32 3, %v184_v6 }
  0x4f   :  { %372 = vmatpush1.msra.mxu0 %v153_v17  ;;  %443 = vmatpush1.msra.mxu1 %v155_v18  ;;  %v58_v63 = vld [vmem:[#allocation5 + $0x28] sm:$0xff]  ;;  %v60_v1 = vld [vmem:[#allocation5 + $0x38] sm:$0xff]  ;;  %v57_v3 = vld [vmem:[#allocation5 + $0x20] sm:$0xff] }
  0x50   :  { %373 = vmatprep.subr.mxu0 %v146_v19  ;;  %444 = vmatprep.subr.mxu1 %v148_v20  ;;  %v59_v4 = vld [vmem:[#allocation5 + $0x30] sm:$0xff]  ;;  %v181_v9 = vld [vmem:[#allocation7] sm:$0xff] }
  0x51   :  { %374 = vmatpush1.msra.mxu0 %v145_v21  ;;  %445 = vmatpush1.msra.mxu1 %v147_v22  ;;  %v186_v12 = vrot.slane %v181_v9, %v185_v7  ;;  %v194_v13 = vrot.slane %v181_v9, %v193_v8  ;;  %v190_v14 = vrot.slane %v181_v9, %v189_v10  ;;  %v201_v22 = vsub.s32 4, %v184_v6 }
  0x52   :  { %375 = vmatprep.subr.mxu0 %v138_v23  ;;  %446 = vmatprep.subr.mxu1 %v140_v24  ;;  %v198_v15 = vrot.slane %v181_v9, %v197_v11  ;;  %v209_v23 = vsub.s32 6, %v184_v6  ;;  %v205_v24 = vsub.s32 5, %v184_v6 }
  0x53   :  { %376 = vmatpush1.msra.mxu0 %v137_v25  ;;  %447 = vmatpush1.msra.mxu1 %v139_v26  ;;  %v213_v25 = vsub.s32 7, %v184_v6  ;;  %v202_v26 = vrot.slane %v181_v9, %v201_v22 }
  0x54   :  { %377 = vmatprep.subr.mxu0 %v130_v27  ;;  %448 = vmatprep.subr.mxu1 %v132_v28  ;;  %v210_v27 = vrot.slane %v181_v9, %v209_v23  ;;  %v206_v28 = vrot.slane %v181_v9, %v205_v24 }
  0x55   :  { %378 = vmatpush1.msra.mxu0 %v129_v29  ;;  %449 = vmatpush1.msra.mxu1 %v131_v30  ;;  %v214_v29 = vrot.slane %v181_v9, %v213_v25 }
  0x56   :  { %379 = vmatprep.subr.mxu0 %v122_v31  ;;  %450 = vmatprep.subr.mxu1 %v124_v32 }
  0x57   :  { %380 = vmatpush1.msra.mxu0 %v121_v33  ;;  %451 = vmatpush1.msra.mxu1 %v123_v34 }
  0x58   :  { %381 = vmatprep.subr.mxu0 %v114_v35  ;;  %452 = vmatprep.subr.mxu1 %v116_v36 }
  0x59   :  { %382 = vmatpush1.msra.mxu0 %v113_v37  ;;  %453 = vmatpush1.msra.mxu1 %v115_v38 }
  0x5a   :  { %383 = vmatprep.subr.mxu0 %v106_v39  ;;  %454 = vmatprep.subr.mxu1 %v108_v40 }
  0x5b   :  { %384 = vmatpush1.msra.mxu0 %v105_v41  ;;  %455 = vmatpush1.msra.mxu1 %v107_v42 }
  0x5c   :  { %385 = vmatprep.subr.mxu0 %v98_v43  ;;  %456 = vmatprep.subr.mxu1 %v100_v44 }
  0x5d   :  { %386 = vmatpush1.msra.mxu0 %v97_v45  ;;  %457 = vmatpush1.msra.mxu1 %v99_v46 }
  0x5e   :  { %387 = vmatprep.subr.mxu0 %v90_v47  ;;  %458 = vmatprep.subr.mxu1 %v92_v48 }
  0x5f   :  { %388 = vmatpush1.msra.mxu0 %v89_v49  ;;  %459 = vmatpush1.msra.mxu1 %v91_v50 }
  0x60   :  { %389 = vmatprep.subr.mxu0 %v82_v51  ;;  %460 = vmatprep.subr.mxu1 %v84_v52 }
  0x61   :  { %390 = vmatpush1.msra.mxu0 %v81_v53  ;;  %461 = vmatpush1.msra.mxu1 %v83_v54 }
  0x62   :  { %391 = vmatprep.subr.mxu0 %v74_v55  ;;  %462 = vmatprep.subr.mxu1 %v76_v56 }
  0x63   :  { %392 = vmatpush1.msra.mxu0 %v73_v57  ;;  %463 = vmatpush1.msra.mxu1 %v75_v58 }
  0x64   :  { %393 = vmatprep.subr.mxu0 %v66_v59  ;;  %464 = vmatprep.subr.mxu1 %v68_v60 }
  0x65   :  { %394 = vmatpush1.msra.mxu0 %v65_v61  ;;  %465 = vmatpush1.msra.mxu1 %v67_v62 }
  0x66   :  { %395 = vmatprep.subr.mxu0 %v58_v63  ;;  %466 = vmatprep.subr.mxu1 %v60_v1 }
  0x67   :  { %396 = vmatpush1.msra.mxu0 %v57_v3  ;;  %429 = vmatprep.mubr.f32.mxu0 %v629_v0 }
  0x68   :  { %467 = vmatpush1.msra.mxu1 %v59_v4  ;;  %500 = vmatprep.mubr.f32.mxu1 %v629_v0 }
  0x69   :  { %430 = vmatmul.mubr.f32.vlgmr.msra.gmra.mxu0 %v662_v2  ;;  %501 = vmatmul.mubr.f32.vlgmr.msra.gmra.mxu1 %v662_v2 }
 0x107   :  { %v289_v16 = vpop.f32.mrf.mxu0  ;;  %v360_v17 = vpop.f32.mrf.mxu1 }
 0x108   :  { %v290_v18 = vadd.f32 %v289_v16, %v186_v12  ;;  %v361_v19 = vadd.f32 %v360_v17, %v194_v13 }
 0x109   :  { %v291_v0 = vpop.f32.mrf.mxu0  ;;  %v362_v20 = vpop.f32.mrf.mxu1 }
 0x10a   :  { %507 = vst [vmem:[#allocation8] sm:$0xff] %v290_v18  ;;  %509 = vst [vmem:[#allocation8 + $0x10] sm:$0xff] %v361_v19  ;;  %v292_v2 = vadd.f32 %v291_v0, %v190_v14  ;;  %v363_v21 = vadd.f32 %v362_v20, %v198_v15 }
 0x10c   :  { %508 = vst [vmem:[#allocation8 + $0x8] sm:$0xff] %v292_v2  ;;  %510 = vst [vmem:[#allocation8 + $0x18] sm:$0xff] %v363_v21 }
 0x129   :  { %v431_v30 = vpop.f32.mrf.mxu0  ;;  %v502_v31 = vpop.f32.mrf.mxu1 }
 0x12a   :  { %v432_v32 = vadd.f32 %v431_v30, %v202_v26  ;;  %v503_v33 = vadd.f32 %v502_v31, %v210_v27 }
 0x12b   :  { %v433_v34 = vpop.f32.mrf.mxu0  ;;  %v504_v35 = vpop.f32.mrf.mxu1 }
 0x12c   :  { %511 = vst [vmem:[#allocation8 + $0x20] sm:$0xff] %v432_v32  ;;  %513 = vst [vmem:[#allocation8 + $0x30] sm:$0xff] %v503_v33  ;;  %v434_v36 = vadd.f32 %v433_v34, %v206_v28  ;;  %v505_v37 = vadd.f32 %v504_v35, %v214_v29 }
 0x12e   :  { %512 = vst [vmem:[#allocation8 + $0x28] sm:$0xff] %v434_v36  ;;  %514 = vst [vmem:[#allocation8 + $0x38] sm:$0xff] %v505_v37 }
 0x12f   :  { %609 = shalt.err (!%p606_p5)
}
 0x130   :  { %524 = dma.vmem_to_hbm [thread:$0]  %s522_s2, 1024, %s676_s3, [#allocation4]  }
 0x131   :  { %622 = dma.done.wait [#allocation4], 1024  }
 0x132   :  { %623 = vsyncadd [#allocation4], 4294966272 }
 0x133   :  { %528 = vsyncpa [#allocation3], 1 }
 0x134   :  { %529 = vsyncpa [#allocation6], 1 }
 0x135   :  { %530 = vsyncpa [#allocation4], 1 }

</bundles_post_ra>
